<compile_context>
chip_gen: v7x
topology: tpu7x:2x2x1
jax: 0.10.0
libtpu: 0.0.40
codegen_flags: <defaults>
</compile_context>

<pallas_src>
import numpy as np
import jax
import jax.numpy as jnp
from jax.experimental import pallas as pl
from jax.experimental.pallas import tpu as pltpu

# ----- small, module-consistent shapes -----
B, S, D = 2, 8, 32          # batch, seqlen, dim
H = 2                       # n_head
HD = D // H                 # head_dim
I = 64                      # FFN intermediate_size
EPS = 1e-5                  # RMSNorm eps
SCALE = HD ** (-0.5)        # attention scale (head_dim ** -0.5)
N = B * S                   # collapsed rows (batch folded into the row dim)


def _build_constants():
    """Trace-time constants: block-diag-causal bias and .view-quirk selection matrices."""
    r = np.arange(N)
    same_batch = (r[:, None] // S) == (r[None, :] // S)
    causal = (r[None, :] % S) <= (r[:, None] % S)
    bias = np.where(same_batch & causal, 0.0, -np.inf).astype(np.float32)   # (N, N)

    # C = vstack(head0, head1) has row index  j = h*N + (b*S + n).
    # h_flat[b*S+n', p*HD+d] = heads[h][b*S+n, d] with h*S+n = H*n'+p (raw torch .view).
    sel = np.zeros((H, N, H * N), np.float32)
    for p in range(H):
        for rr in range(N):
            b, n_prime = divmod(rr, S)
            h, n = divmod(H * n_prime + p, S)
            sel[p, rr, h * N + b * S + n] = 1.0
    return bias, sel


_ATTN_BIAS, _SEL = _build_constants()

# advisory cost estimate (f32 flops / transcendentals / bytes moved)
_FLOPS = (2 * N * D * (3 * D)            # QKV
          + 2 * H * (2 * N * N * HD)     # scores + P@V
          + 2 * (H * N) * HD * (2 * D)   # C @ [wout_0 || wout_1]
          + 2 * H * (N * (H * N) * D)    # two selection matmuls
          + 2 * N * D * (2 * I)          # W1 || W3
          + 2 * N * I * D)               # W2
_TRANS = H * N * N + N + H * N
_BYTES = 4 * (N * D + D + D * 3 * D + N * N + 2 * N * H * N
              + HD * 2 * D + D * 2 * I + I * D + N * D)


def _block_kernel(x_ref, rmsw_ref, wqkv_ref, bias_ref, sel0_ref, sel1_ref,
                  woutq_ref, w13_ref, w2_ref, o_ref):
    """Fused TransformerBlock over the batch-collapsed (N, D) = (16, 32) row block.

    x_ref  : (N, D)        rmsw_ref : (1, D)        wqkv : (D, 3D)
    bias   : (N, N)  0 / -inf, same-batch AND causal
    sel0/1 : (N, H*N) 0/1 selection matrices for the torch `.view` quirk
    woutq  : (HD, 2D)  = [wout[:HD] || wout[HD:]]   w13 : (D, 2I) = [W1 || W3]   w2 : (I, D)
    o_ref  : (N, D)
    """
    x = x_ref[...].astype(jnp.float32)                                  # (N, D)

    # ---- RMSNorm: x * rsqrt(mean(x^2, -1) + eps) * weight ----
    ms = jnp.mean(x * x, axis=-1, keepdims=True)
    xn = x * jax.lax.rsqrt(ms + EPS) * rmsw_ref[...]                    # (N, D)

    # ---- fused QKV projection (single MXU matmul over all 16 rows) ----
    qkv = jnp.dot(xn, wqkv_ref[...], preferred_element_type=jnp.float32)  # (N, 3D)

    bias = bias_ref[...]                                                # (N, N)

    # ---- per-head causal softmax attention over the collapsed rows ----
    heads = []
    for h in range(H):
        q = qkv[:, h * HD:(h + 1) * HD]                                 # (N, HD)
        k = qkv[:, D + h * HD:D + (h + 1) * HD]                         # (N, HD)
        v = qkv[:, 2 * D + h * HD:2 * D + (h + 1) * HD]                 # (N, HD)
        s = jax.lax.dot_general(q, k, (((1,), (1,)), ((), ())),
                                preferred_element_type=jnp.float32) * SCALE
        s = s + bias                                                    # cross-batch -> -inf
        s = s - jnp.max(s, axis=-1, keepdims=True)
        p = jnp.exp(s)
        p = p * pl.reciprocal(jnp.sum(p, axis=-1, keepdims=True), approx=False)
        # dropout p=0.0 -> identity
        heads.append(jnp.dot(p, v, preferred_element_type=jnp.float32))  # (N, HD)

    # ---- torch `.view(bs, seqlen, h*d)` quirk fused with the out-projection ----
    # a = h_flat @ wout = Sel0 @ (C @ wout[:HD]) + Sel1 @ (C @ wout[HD:])
    C = jnp.concatenate(heads, axis=0)                                  # (H*N, HD)
    pw = jnp.dot(C, woutq_ref[...], preferred_element_type=jnp.float32)  # (H*N, 2D)
    a0 = jnp.dot(sel0_ref[...], pw[:, :D], preferred_element_type=jnp.float32)  # (N, D)
    a1 = jnp.dot(sel1_ref[...], pw[:, D:], preferred_element_type=jnp.float32)  # (N, D)
    a = a0 + a1                                                         # independent accumulators

    # ---- FFN: W2(relu(W1 a) + W3 a), W1||W3 fused into one 128-lane matmul ----
    t = jnp.dot(a, w13_ref[...], preferred_element_type=jnp.float32)    # (N, 2I)
    z = jnp.maximum(t[:, :I], 0.0) + t[:, I:]                           # (N, I)
    ffn = jnp.dot(z, w2_ref[...], preferred_element_type=jnp.float32)   # (N, D)

    # ---- residual ----
    o_ref[...] = (x + ffn).astype(o_ref.dtype)


@jax.jit
def transformer_block(x, params):
    x2 = x.reshape(N, D)                                            # collapse batch into rows
    rmsw = params["rms_w"].reshape(1, D)
    # fuse W1 and W3 into one lane-dense (D, 2I) weight; pre-split wout into lane blocks
    w13 = jnp.concatenate([params["w1"], params["w3"]], axis=1)     # (32, 128)
    woutq = jnp.concatenate([params["wout"][:HD, :], params["wout"][HD:, :]], axis=1)  # (16, 64)

    out2 = pl.pallas_call(
        _block_kernel,
        out_shape=jax.ShapeDtypeStruct((N, D), x.dtype),
        grid_spec=pltpu.PrefetchScalarGridSpec(
            num_scalar_prefetch=0,
            grid=(1,),                                              # single launch: latency-bound size
            in_specs=[
                pl.BlockSpec((N, D), lambda i: (0, 0)),             # x (collapsed)
                pl.BlockSpec((1, D), lambda i: (0, 0)),             # rms weight
                pl.BlockSpec((D, 3 * D), lambda i: (0, 0)),         # wqkv
                pl.BlockSpec((N, N), lambda i: (0, 0)),             # block-diag causal bias
                pl.BlockSpec((N, H * N), lambda i: (0, 0)),         # sel0
                pl.BlockSpec((N, H * N), lambda i: (0, 0)),         # sel1
                pl.BlockSpec((HD, 2 * D), lambda i: (0, 0)),        # wout (quirk layout)
                pl.BlockSpec((D, 2 * I), lambda i: (0, 0)),         # w1 || w3
                pl.BlockSpec((I, D), lambda i: (0, 0)),             # w2
            ],
            out_specs=pl.BlockSpec((N, D), lambda i: (0, 0)),
        ),
        compiler_params=pltpu.CompilerParams(dimension_semantics=("arbitrary",)),
        cost_estimate=pl.CostEstimate(flops=_FLOPS, transcendentals=_TRANS,
                                      bytes_accessed=_BYTES),
    )(x2, rmsw, params["wqkv"], _ATTN_BIAS, _SEL[0], _SEL[1], woutq, w13, params["w2"])

    return out2.reshape(B, S, D)


def reference(x, params):
    """Pure-JAX reference mirroring the PyTorch forward exactly."""
    xf = x.astype(jnp.float32)
    xn = xf * jax.lax.rsqrt(jnp.mean(xf * xf, -1, keepdims=True) + EPS) * params["rms_w"]
    qkv = xn @ params["wqkv"]                                   # (B, S, 3D)
    qkv = qkv.reshape(B, S, 3, H, HD).transpose(2, 0, 3, 1, 4)  # 'b n (qkv h d) -> qkv b h n d'
    q, k, v = qkv[0], qkv[1], qkv[2]                            # (B, H, S, HD)
    s = jnp.einsum("bhqd,bhkd->bhqk", q, k) * SCALE
    mask = jnp.tril(jnp.ones((S, S), dtype=bool))
    s = jnp.where(mask[None, None], s, -jnp.inf)
    p = jax.nn.softmax(s, axis=-1)
    o = jnp.einsum("bhqk,bhkd->bhqd", p, v)
    o = o.reshape(B, S, H * HD)                                 # torch .view semantics
    a = o @ params["wout"]
    ffn = (jax.nn.relu(a @ params["w1"]) + a @ params["w3"]) @ params["w2"]
    return x + ffn


def init_params(key):
    ks = jax.random.split(key, 5)
    scale = 0.02
    return {
        "rms_w": jnp.ones((D,), jnp.float32),                       # RMSNorm weight init = ones
        "wqkv": scale * jax.random.normal(ks[0], (D, 3 * D), jnp.float32),
        "wout": scale * jax.random.normal(ks[1], (D, D), jnp.float32),
        "w1":   scale * jax.random.normal(ks[2], (D, I), jnp.float32),
        "w3":   scale * jax.random.normal(ks[3], (D, I), jnp.float32),
        "w2":   scale * jax.random.normal(ks[4], (I, D), jnp.float32),
    }


if __name__ == "__main__":
    key = jax.random.PRNGKey(0)
    kx, kp = jax.random.split(key)
    x = jax.random.normal(kx, (B, S, D), jnp.float32)
    params = init_params(kp)

    out = jax.block_until_ready(transformer_block(x, params))

    ref = reference(x, params)
    assert out.shape == (B, S, D)
    assert jnp.allclose(out, ref, atol=1e-4, rtol=1e-4), float(jnp.max(jnp.abs(out - ref)))
    print("KERNEL_OK")
</pallas_src>

<mosaic_0001>
module attributes {stable_mosaic.version = 11 : i64} {
  func.func @_block_kernel(%arg0: i32, %arg1: memref<16x32xf32, #tpu.memory_space<vmem>>, %arg2: memref<1x32xf32, #tpu.memory_space<vmem>>, %arg3: memref<32x96xf32, #tpu.memory_space<vmem>>, %arg4: memref<16x16xf32, #tpu.memory_space<vmem>>, %arg5: memref<16x32xf32, #tpu.memory_space<vmem>>, %arg6: memref<16x32xf32, #tpu.memory_space<vmem>>, %arg7: memref<16x64xf32, #tpu.memory_space<vmem>>, %arg8: memref<32x128xf32, #tpu.memory_space<vmem>>, %arg9: memref<64x32xf32, #tpu.memory_space<vmem>>, %arg10: memref<16x32xf32, #tpu.memory_space<vmem>>) attributes {dimension_semantics = [#tpu.dimension_semantics<arbitrary>], iteration_bounds = array<i64: 1>, scalar_prefetch = 0 : i64, scratch_operands = 0 : i64, tpu.core_type = #tpu.core_type<tc>, window_params = [{pipeline_mode = #tpu.pipeline_mode<synchronous>, transform_indices = @transform_0, window_bounds = array<i64: 16, 32>}, {pipeline_mode = #tpu.pipeline_mode<synchronous>, transform_indices = @transform_1, window_bounds = array<i64: 1, 32>}, {pipeline_mode = #tpu.pipeline_mode<synchronous>, transform_indices = @transform_2, window_bounds = array<i64: 32, 96>}, {pipeline_mode = #tpu.pipeline_mode<synchronous>, transform_indices = @transform_3, window_bounds = array<i64: 16, 16>}, {pipeline_mode = #tpu.pipeline_mode<synchronous>, transform_indices = @transform_4, window_bounds = array<i64: 16, 32>}, {pipeline_mode = #tpu.pipeline_mode<synchronous>, transform_indices = @transform_5, window_bounds = array<i64: 16, 32>}, {pipeline_mode = #tpu.pipeline_mode<synchronous>, transform_indices = @transform_6, window_bounds = array<i64: 16, 64>}, {pipeline_mode = #tpu.pipeline_mode<synchronous>, transform_indices = @transform_7, window_bounds = array<i64: 32, 128>}, {pipeline_mode = #tpu.pipeline_mode<synchronous>, transform_indices = @transform_8, window_bounds = array<i64: 64, 32>}, {pipeline_mode = #tpu.pipeline_mode<synchronous>, transform_indices = @transform_9, window_bounds = array<i64: 16, 32>}]} {
    %c0 = arith.constant 0 : index
    %c0_0 = arith.constant 0 : index
    %0 = vector.load %arg1[%c0, %c0_0] : memref<16x32xf32, #tpu.memory_space<vmem>>, vector<16x32xf32>
    %1 = arith.mulf %0, %0 : vector<16x32xf32>
    %cst = arith.constant dense<0.000000e+00> : vector<16xf32>
    %2 = vector.multi_reduction <add>, %1, %cst [1] : vector<16x32xf32> to vector<16xf32>
    %3 = vector.shape_cast %2 : vector<16xf32> to vector<16x1xf32>
    %cst_1 = arith.constant 3.200000e+01 : f32
    %4 = vector.broadcast %cst_1 : f32 to vector<16x1xf32>
    %5 = arith.divf %3, %4 : vector<16x1xf32>
    %cst_2 = arith.constant 9.99999974E-6 : f32
    %6 = vector.broadcast %cst_2 : f32 to vector<16x1xf32>
    %7 = arith.addf %5, %6 : vector<16x1xf32>
    %8 = math.rsqrt %7 : vector<16x1xf32>
    %9 = vector.broadcast %8 : vector<16x1xf32> to vector<16x32xf32>
    %10 = arith.mulf %0, %9 : vector<16x32xf32>
    %c0_3 = arith.constant 0 : index
    %c0_4 = arith.constant 0 : index
    %11 = vector.load %arg2[%c0_3, %c0_4] : memref<1x32xf32, #tpu.memory_space<vmem>>, vector<1x32xf32>
    %12 = vector.broadcast %11 : vector<1x32xf32> to vector<16x32xf32>
    %13 = arith.mulf %10, %12 : vector<16x32xf32>
    %c0_5 = arith.constant 0 : index
    %c0_6 = arith.constant 0 : index
    %14 = vector.load %arg3[%c0_5, %c0_6] : memref<32x96xf32, #tpu.memory_space<vmem>>, vector<32x96xf32>
    %cst_7 = arith.constant dense<0.000000e+00> : vector<16x96xf32>
    %15 = tpu.matmul %13, %14, %cst_7 {dimension_numbers = #tpu.dot_dimension_numbers<[1], [0], [0], [1], [0, 0, 1, 1], [], []>} : vector<16x32xf32>, vector<32x96xf32>, vector<16x96xf32> -> vector<16x96xf32>
    %c0_8 = arith.constant 0 : index
    %c0_9 = arith.constant 0 : index
    %16 = vector.load %arg4[%c0_8, %c0_9] : memref<16x16xf32, #tpu.memory_space<vmem>>, vector<16x16xf32>
    %17 = vector.extract_strided_slice %15 {offsets = [0, 0], sizes = [16, 16], strides = [1, 1]} : vector<16x96xf32> to vector<16x16xf32>
    %18 = vector.extract_strided_slice %15 {offsets = [0, 32], sizes = [16, 16], strides = [1, 1]} : vector<16x96xf32> to vector<16x16xf32>
    %19 = vector.extract_strided_slice %15 {offsets = [0, 64], sizes = [16, 16], strides = [1, 1]} : vector<16x96xf32> to vector<16x16xf32>
    %cst_10 = arith.constant dense<0.000000e+00> : vector<16x16xf32>
    %20 = tpu.matmul %17, %18, %cst_10 {dimension_numbers = #tpu.dot_dimension_numbers<[1], [1], [0], [0], [0, 0, 1, 0], [], []>} : vector<16x16xf32>, vector<16x16xf32>, vector<16x16xf32> -> vector<16x16xf32>
    %cst_11 = arith.constant 2.500000e-01 : f32
    %21 = vector.broadcast %cst_11 : f32 to vector<16x16xf32>
    %22 = arith.mulf %20, %21 : vector<16x16xf32>
    %23 = arith.addf %22, %16 : vector<16x16xf32>
    %cst_12 = arith.constant dense<0xFF800000> : vector<16xf32>
    %24 = vector.multi_reduction <maximumf>, %23, %cst_12 [1] : vector<16x16xf32> to vector<16xf32>
    %25 = vector.shape_cast %24 : vector<16xf32> to vector<16x1xf32>
    %26 = vector.broadcast %25 : vector<16x1xf32> to vector<16x16xf32>
    %27 = arith.subf %23, %26 : vector<16x16xf32>
    %28 = math.exp %27 : vector<16x16xf32>
    %cst_13 = arith.constant dense<0.000000e+00> : vector<16xf32>
    %29 = vector.multi_reduction <add>, %28, %cst_13 [1] : vector<16x16xf32> to vector<16xf32>
    %30 = vector.shape_cast %29 : vector<16xf32> to vector<16x1xf32>
    %31 = tpu.reciprocal %30 : vector<16x1xf32> -> vector<16x1xf32>
    %32 = vector.broadcast %31 : vector<16x1xf32> to vector<16x16xf32>
    %33 = arith.mulf %28, %32 : vector<16x16xf32>
    %cst_14 = arith.constant dense<0.000000e+00> : vector<16x16xf32>
    %34 = tpu.matmul %33, %19, %cst_14 {dimension_numbers = #tpu.dot_dimension_numbers<[1], [0], [0], [1], [0, 0, 1, 1], [], []>} : vector<16x16xf32>, vector<16x16xf32>, vector<16x16xf32> -> vector<16x16xf32>
    %35 = vector.extract_strided_slice %15 {offsets = [0, 16], sizes = [16, 16], strides = [1, 1]} : vector<16x96xf32> to vector<16x16xf32>
    %36 = vector.extract_strided_slice %15 {offsets = [0, 48], sizes = [16, 16], strides = [1, 1]} : vector<16x96xf32> to vector<16x16xf32>
    %37 = vector.extract_strided_slice %15 {offsets = [0, 80], sizes = [16, 16], strides = [1, 1]} : vector<16x96xf32> to vector<16x16xf32>
    %cst_15 = arith.constant dense<0.000000e+00> : vector<16x16xf32>
    %38 = tpu.matmul %35, %36, %cst_15 {dimension_numbers = #tpu.dot_dimension_numbers<[1], [1], [0], [0], [0, 0, 1, 0], [], []>} : vector<16x16xf32>, vector<16x16xf32>, vector<16x16xf32> -> vector<16x16xf32>
    %cst_16 = arith.constant 2.500000e-01 : f32
    %39 = vector.broadcast %cst_16 : f32 to vector<16x16xf32>
    %40 = arith.mulf %38, %39 : vector<16x16xf32>
    %41 = arith.addf %40, %16 : vector<16x16xf32>
    %cst_17 = arith.constant dense<0xFF800000> : vector<16xf32>
    %42 = vector.multi_reduction <maximumf>, %41, %cst_17 [1] : vector<16x16xf32> to vector<16xf32>
    %43 = vector.shape_cast %42 : vector<16xf32> to vector<16x1xf32>
    %44 = vector.broadcast %43 : vector<16x1xf32> to vector<16x16xf32>
    %45 = arith.subf %41, %44 : vector<16x16xf32>
    %46 = math.exp %45 : vector<16x16xf32>
    %cst_18 = arith.constant dense<0.000000e+00> : vector<16xf32>
    %47 = vector.multi_reduction <add>, %46, %cst_18 [1] : vector<16x16xf32> to vector<16xf32>
    %48 = vector.shape_cast %47 : vector<16xf32> to vector<16x1xf32>
    %49 = tpu.reciprocal %48 : vector<16x1xf32> -> vector<16x1xf32>
    %50 = vector.broadcast %49 : vector<16x1xf32> to vector<16x16xf32>
    %51 = arith.mulf %46, %50 : vector<16x16xf32>
    %cst_19 = arith.constant dense<0.000000e+00> : vector<16x16xf32>
    %52 = tpu.matmul %51, %37, %cst_19 {dimension_numbers = #tpu.dot_dimension_numbers<[1], [0], [0], [1], [0, 0, 1, 1], [], []>} : vector<16x16xf32>, vector<16x16xf32>, vector<16x16xf32> -> vector<16x16xf32>
    %53 = tpu.concatenate %34, %52 in 0 : vector<16x16xf32>, vector<16x16xf32> -> vector<32x16xf32>
    %c0_20 = arith.constant 0 : index
    %c0_21 = arith.constant 0 : index
    %54 = vector.load %arg7[%c0_20, %c0_21] : memref<16x64xf32, #tpu.memory_space<vmem>>, vector<16x64xf32>
    %cst_22 = arith.constant dense<0.000000e+00> : vector<32x64xf32>
    %55 = tpu.matmul %53, %54, %cst_22 {dimension_numbers = #tpu.dot_dimension_numbers<[1], [0], [0], [1], [0, 0, 1, 1], [], []>} : vector<32x16xf32>, vector<16x64xf32>, vector<32x64xf32> -> vector<32x64xf32>
    %c0_23 = arith.constant 0 : index
    %c0_24 = arith.constant 0 : index
    %56 = vector.load %arg5[%c0_23, %c0_24] : memref<16x32xf32, #tpu.memory_space<vmem>>, vector<16x32xf32>
    %57 = vector.extract_strided_slice %55 {offsets = [0, 0], sizes = [32, 32], strides = [1, 1]} : vector<32x64xf32> to vector<32x32xf32>
    %cst_25 = arith.constant dense<0.000000e+00> : vector<16x32xf32>
    %58 = tpu.matmul %56, %57, %cst_25 {dimension_numbers = #tpu.dot_dimension_numbers<[1], [0], [0], [1], [0, 0, 1, 1], [], []>} : vector<16x32xf32>, vector<32x32xf32>, vector<16x32xf32> -> vector<16x32xf32>
    %c0_26 = arith.constant 0 : index
    %c0_27 = arith.constant 0 : index
    %59 = vector.load %arg6[%c0_26, %c0_27] : memref<16x32xf32, #tpu.memory_space<vmem>>, vector<16x32xf32>
    %60 = vector.extract_strided_slice %55 {offsets = [0, 32], sizes = [32, 32], strides = [1, 1]} : vector<32x64xf32> to vector<32x32xf32>
    %cst_28 = arith.constant dense<0.000000e+00> : vector<16x32xf32>
    %61 = tpu.matmul %59, %60, %cst_28 {dimension_numbers = #tpu.dot_dimension_numbers<[1], [0], [0], [1], [0, 0, 1, 1], [], []>} : vector<16x32xf32>, vector<32x32xf32>, vector<16x32xf32> -> vector<16x32xf32>
    %62 = arith.addf %58, %61 : vector<16x32xf32>
    %c0_29 = arith.constant 0 : index
    %c0_30 = arith.constant 0 : index
    %63 = vector.load %arg8[%c0_29, %c0_30] : memref<32x128xf32, #tpu.memory_space<vmem>>, vector<32x128xf32>
    %cst_31 = arith.constant dense<0.000000e+00> : vector<16x128xf32>
    %64 = tpu.matmul %62, %63, %cst_31 {dimension_numbers = #tpu.dot_dimension_numbers<[1], [0], [0], [1], [0, 0, 1, 1], [], []>} : vector<16x32xf32>, vector<32x128xf32>, vector<16x128xf32> -> vector<16x128xf32>
    %65 = vector.extract_strided_slice %64 {offsets = [0, 0], sizes = [16, 64], strides = [1, 1]} : vector<16x128xf32> to vector<16x64xf32>
    %cst_32 = arith.constant 0.000000e+00 : f32
    %66 = vector.broadcast %cst_32 : f32 to vector<16x64xf32>
    %67 = arith.maximumf %65, %66 : vector<16x64xf32>
    %68 = vector.extract_strided_slice %64 {offsets = [0, 64], sizes = [16, 64], strides = [1, 1]} : vector<16x128xf32> to vector<16x64xf32>
    %69 = arith.addf %67, %68 : vector<16x64xf32>
    %c0_33 = arith.constant 0 : index
    %c0_34 = arith.constant 0 : index
    %70 = vector.load %arg9[%c0_33, %c0_34] : memref<64x32xf32, #tpu.memory_space<vmem>>, vector<64x32xf32>
    %cst_35 = arith.constant dense<0.000000e+00> : vector<16x32xf32>
    %71 = tpu.matmul %69, %70, %cst_35 {dimension_numbers = #tpu.dot_dimension_numbers<[1], [0], [0], [1], [0, 0, 1, 1], [], []>} : vector<16x64xf32>, vector<64x32xf32>, vector<16x32xf32> -> vector<16x32xf32>
    %72 = arith.addf %0, %71 : vector<16x32xf32>
    %c0_36 = arith.constant 0 : index
    %c0_37 = arith.constant 0 : index
    %73 = vector.load %arg10[%c0_36, %c0_37] : memref<16x32xf32, #tpu.memory_space<vmem>>, vector<16x32xf32>
    tpu.vector_store %arg10[%c0_36, %c0_37], %72 {strides = array<i32>} : memref<16x32xf32, #tpu.memory_space<vmem>>, vector<16x32xf32>,
    return
  }
  func.func @transform_0(%arg0: i32) -> (i32, i32) {
    %c0_i32 = arith.constant 0 : i32
    %c0_i32_0 = arith.constant 0 : i32
    %c0_i32_1 = arith.constant 0 : i32
    return %c0_i32, %c0_i32_0 : i32, i32
  }
  func.func @transform_1(%arg0: i32) -> (i32, i32) {
    %c0_i32 = arith.constant 0 : i32
    %c0_i32_0 = arith.constant 0 : i32
    %c0_i32_1 = arith.constant 0 : i32
    return %c0_i32, %c0_i32_0 : i32, i32
  }
  func.func @transform_2(%arg0: i32) -> (i32, i32) {
    %c0_i32 = arith.constant 0 : i32
    %c0_i32_0 = arith.constant 0 : i32
    %c0_i32_1 = arith.constant 0 : i32
    return %c0_i32, %c0_i32_0 : i32, i32
  }
  func.func @transform_3(%arg0: i32) -> (i32, i32) {
    %c0_i32 = arith.constant 0 : i32
    %c0_i32_0 = arith.constant 0 : i32
    %c0_i32_1 = arith.constant 0 : i32
    return %c0_i32, %c0_i32_0 : i32, i32
  }
  func.func @transform_4(%arg0: i32) -> (i32, i32) {
    %c0_i32 = arith.constant 0 : i32
    %c0_i32_0 = arith.constant 0 : i32
    %c0_i32_1 = arith.constant 0 : i32
    return %c0_i32, %c0_i32_0 : i32, i32
  }
  func.func @transform_5(%arg0: i32) -> (i32, i32) {
    %c0_i32 = arith.constant 0 : i32
    %c0_i32_0 = arith.constant 0 : i32
    %c0_i32_1 = arith.constant 0 : i32
    return %c0_i32, %c0_i32_0 : i32, i32
  }
  func.func @transform_6(%arg0: i32) -> (i32, i32) {
    %c0_i32 = arith.constant 0 : i32
    %c0_i32_0 = arith.constant 0 : i32
    %c0_i32_1 = arith.constant 0 : i32
    return %c0_i32, %c0_i32_0 : i32, i32
  }
  func.func @transform_7(%arg0: i32) -> (i32, i32) {
    %c0_i32 = arith.constant 0 : i32
    %c0_i32_0 = arith.constant 0 : i32
    %c0_i32_1 = arith.constant 0 : i32
    return %c0_i32, %c0_i32_0 : i32, i32
  }
  func.func @transform_8(%arg0: i32) -> (i32, i32) {
    %c0_i32 = arith.constant 0 : i32
    %c0_i32_0 = arith.constant 0 : i32
    %c0_i32_1 = arith.constant 0 : i32
    return %c0_i32, %c0_i32_0 : i32, i32
  }
  func.func @transform_9(%arg0: i32) -> (i32, i32) {
    %c0_i32 = arith.constant 0 : i32
    %c0_i32_0 = arith.constant 0 : i32
    %c0_i32_1 = arith.constant 0 : i32
    return %c0_i32, %c0_i32_0 : i32, i32
  }
}

</mosaic_0001>

<bundles_post_ra>
// kernel: transformer_block.1
= control target key start
LH: loop header
LB: loop body
LE: loop exit
PB: predicated region body
PF: predicated region fallthrough
CT: control target
= control target key end

     0   :  { %vm37_vm0 = vcmask 261120   ;;  %s1593_s0 = inlined_call_operand.vmem [shape: f32[16,32], index: 0, kind: input, shape index: {}]   ;;  %s1594_s1 = inlined_call_operand.vmem [shape: f32[1,32], index: 1, kind: input, shape index: {}]   ;;  %s1595_s2 = inlined_call_operand.vmem [shape: f32[32,96], index: 2, kind: input, shape index: {}]   ;;  %s1596_s3 = inlined_call_operand.vmem [shape: f32[16,16], index: 3, kind: input, shape index: {}]   ;;  %s1597_s4 = inlined_call_operand.vmem [shape: f32[16,32], index: 4, kind: input, shape index: {}]   ;;  %s1598_s5 = inlined_call_operand.vmem [shape: f32[16,32], index: 5, kind: input, shape index: {}]   ;;  %s1599_s6 = inlined_call_operand.vmem [shape: f32[16,64], index: 6, kind: input, shape index: {}]   ;;  %s1600_s7 = inlined_call_operand.vmem [shape: f32[32,128], index: 7, kind: input, shape index: {}]   ;;  %s1601_s8 = inlined_call_operand.vmem [shape: f32[64,32], index: 8, kind: input, shape index: {}]   ;;  %s1602_s9 = inlined_call_operand.hbm [shape: f32[16,32], index: 9, kind: output, shape index: {}]  }
   0x1   :  { %v1445_v0 = vld [vmem:[%s1593_s0] sm:$0xff]  ;;  %v1450_v1 = vld [vmem:[%s1593_s0 + $0x8] sm:$0xff] }
   0x2   :  { %14 = vsyncpa [#allocation3], 0  ;;  %v35_v2 = vmul.f32 %v1445_v0, %v1445_v0  ;;  %v36_v3 = vmul.f32 %v1450_v1, %v1450_v1  ;;  %v62_v6 = vld [vmem:[%s1595_s2] sm:$0xff]  ;;  %v63_v7 = vld [vmem:[%s1595_s2 + $0x8] sm:$0xff]  ;;  %vm155_vm1 = vcmask 130048   ;;  %s1386_s22 = smov 80  }
   0x3   :  { %v64_v8 = vld [vmem:[%s1595_s2 + $0x10] sm:$0xff]  ;;  %v1228_v9 = vpack.c.bf16 %v63_v7, %v62_v6  ;;  %v65_v10 = vld [vmem:[%s1595_s2 + $0x18] sm:$0xff]  ;;  %v1044_v19 = vld [vmem:[%s1594_s1] ss:$0 sm:$0xff]  ;;  %s1384_s2 = smov 112   ;;  %s1385_s1 = smov 96  }
   0x4   :  { %v38_v4 = vsel %vm37_vm0, %v35_v2, 0.0  ;;  %v41_v5 = vsel %vm37_vm0, %v36_v3, 0.0  ;;  %v1232_v11 = vpack.c.bf16 %v65_v10, %v64_v8  ;;  %vm1237_vm2 = vmpackc.low %vm155_vm1, %vm155_vm1  ;;  %v148_v39 = vld [vmem:[%s1596_s3 + $0x8] sm:$0xff]  ;;  %v147_v42 = vld [vmem:[%s1596_s3] sm:$0xff]  ;;  %s1387_s3 = smov 48   ;;  %s1388_s27 = smov 64  }
   0x5   :  { %39 = vadd.xlane.f32.xlu0 %v38_v4  ;;  %1229 = vmatprep.subr.bf16.mxu1 %v1228_v9  ;;  %vm942_vm3 = vcmask 523264   ;;  %s1389_s14 = smov [#allocation2]  }
   0x6   :  { %1231 = vmatpush3.bf16.msra.mxu1 %v1228_v9 }
   0x7   :  { %1233 = vmatprep.subr.bf16.mxu1 %v1232_v11 }
   0x9   :  { %42 = vadd.xlane.f32.xlu0 %v41_v5 }
   0xa   :  { %1235 = vmatpush3.bf16.msra.mxu1 %v1232_v11 }
  0x92   :  { %v40_v12 = vpop.xlane.xlu0 %39 }
  0x93   :  { %v45_v13 = vmul.f32 0.03125, %v40_v12 }
  0x95   :  { %v47_v14 = vadd.f32 1e-05, %v45_v13 }
  0x96   :  { %v43_v15 = vpop.xlane.xlu0 %42 }
  0x97   :  { %1340 = vrsqrt.f32 %v47_v14  ;;  %v46_v16 = vmul.f32 0.03125, %v43_v15 }
  0x99   :  { %v48_v17 = vadd.f32 1e-05, %v46_v16 }
  0x9b   :  { %1342 = vrsqrt.f32 %v48_v17 }
  0xa1   :  { %v1341_v18 = vpop.eup %1340 }
  0xa2   :  { %v51_v20 = vmul.f32 %v1341_v18, %v1445_v0 }
  0xa4   :  { %v60_v21 = vmul.f32 %v1044_v19, %v51_v20 }
  0xa5   :  { %v1343_v22 = vpop.eup %1342 }
  0xa6   :  { %v52_v23 = vmul.f32 %v1343_v22, %v1450_v1  ;;  %1135 = vmatprep.mubr.msk.f32.mxu1 %vm37_vm0, %v60_v21 }
  0xa8   :  { %v61_v24 = vmul.f32 %v1044_v19, %v52_v23 }
  0xaa   :  { %1136 = vmatmul.mubr.msk.f32.vlgmr.msra.gmra.mrb[0].mxu1 %vm37_vm0, %v61_v24 }
 0x17d   :  { %v1137_v25 = vpop.f32.mrb[0].mxu1 }
 0x17e   :  { %v138_v26 = vpop.f32.mrb[1].mxu1 }
 0x17f   :  { %352 = vrot.lane.b32.xlu0 %v138_v26, %s1384_s2  ;;  %1142 = vmatprep.mubr.msk.f32.mxu1 %vm155_vm1, %v138_v26  ;;  %v1478_v27 = vpack.i.bf16 %v1137_v25, %v138_v26  ;;  %v556_v26 = vld [vmem:[%s1599_s6] sm:$0xff] }
 0x181   :  { %1311 = vrot.lane.b32.xlu1 %v1478_v27, %s1385_s1 }
 0x185   :  { %1316 = vrot.lane.b32.xlu1 %v1478_v27, %s1386_s22 }
 0x189   :  { %354 = vrot.lane.b32.xlu1 %v1137_v25, %s1384_s2 }
 0x1f1   :  { %v353_v36 = vpop.permute.xlu0 %352 }
 0x1f3   :  { %v1312_v28 = vpop.permute.xlu1 %1311 }
 0x1f4   :  { %v1314_v29 = vunpack.i.h.bf16 %v1312_v28  ;;  %v1313_v30 = vunpack.i.l.bf16 %v1312_v28 }
 0x1f6   :  { %v1236_v31 = vpack.c.bf16 %v1314_v29, %v1313_v30 }
 0x1f7   :  { %v1317_v32 = vpop.permute.xlu1 %1316 }
 0x1f8   :  { %v1319_v33 = vunpack.i.h.bf16 %v1317_v32  ;;  %v1318_v34 = vunpack.i.l.bf16 %v1317_v32  ;;  %1238 = vmatprep.subr.msk.bf16.mxu1 %vm1237_vm2, %v1236_v31 }
 0x1f9   :  { %1241 = vmatpush3.bf16.xpose.msk.msra.mxu1 %vm1237_vm2, %v1236_v31 }
 0x1fa   :  { %v1246_v35 = vpack.c.bf16 %v1319_v33, %v1318_v34 }
 0x1fb   :  { %v355_v37 = vpop.permute.xlu1 %354 }
 0x1fc   :  { %1248 = vmatprep.subr.msk.bf16.mxu1 %vm1237_vm2, %v1246_v35 }
 0x200   :  { %1143 = vmatmul.mubr.msk.f32.vlgmr.msra.gmra.mrb[2].mxu1 %vm155_vm1, %v1137_v25 }
 0x201   :  { %1251 = vmatpush3.bf16.xpose.msk.msra.mxu1 %vm1237_vm2, %v1246_v35  ;;  %1156 = vmatprep.mubr.msk.f32.mxu1 %vm155_vm1, %v353_v36 }
 0x208   :  { %1157 = vmatmul.mubr.msk.f32.vlgmr.msra.gmra.mrb[4].mxu1 %vm155_vm1, %v355_v37 }
 0x2d3   :  { %v1144_v38 = vpop.f32.mrb[2].mxu1 }
 0x2d4   :  { %v240_v40 = vmul.f32 0.25, %v1144_v38  ;;  %v230_v41 = vpop.f32.mrb[3].mxu1 }
 0x2d5   :  { %v239_v43 = vmul.f32 0.25, %v230_v41 }
 0x2d6   :  { %v242_v44 = vadd.f32 %v240_v40, %v148_v39 }
 0x2d7   :  { %v241_v45 = vadd.f32 %v239_v43, %v147_v42 }
 0x2d8   :  { %v246_v46 = vsel %vm155_vm1, %v242_v44, -inf }
 0x2d9   :  { %247 = vmax.xlane.f32.xlu0 %v246_v46  ;;  %v243_v47 = vsel %vm155_vm1, %v241_v45, -inf }
 0x2da   :  { %244 = vmax.xlane.f32.xlu1 %v243_v47 }
 0x2db   :  { %v1158_v48 = vpop.f32.mrb[4].mxu1 }
 0x2dc   :  { %v434_v49 = vpop.f32.mrb[5].mxu1  ;;  %v444_v50 = vmul.f32 0.25, %v1158_v48 }
 0x2dd   :  { %v443_v51 = vmul.f32 0.25, %v434_v49 }
 0x2de   :  { %v446_v54 = vadd.f32 %v444_v50, %v148_v39  ;;  %v837_v50 = vld [vmem:[%s1600_s7] sm:$0xff] }
 0x2df   :  { %v445_v52 = vadd.f32 %v443_v51, %v147_v42  ;;  %v838_v51 = vld [vmem:[%s1600_s7 + $0x8] sm:$0xff] }
 0x2e0   :  { %v450_v55 = vsel %vm155_vm1, %v446_v54, -inf }
 0x2e1   :  { %v447_v53 = vsel %vm155_vm1, %v445_v52, -inf }
 0x2e2   :  { %448 = vmax.xlane.f32.xlu1 %v447_v53  ;;  %v1276_v53 = vpack.c.bf16 %v838_v51, %v837_v50 }
 0x2e6   :  { %451 = vmax.xlane.f32.xlu1 %v450_v55 }
 0x366   :  { %v248_v56 = vpop.xlane.xlu0 %247 }
 0x367   :  { %v250_v57 = vsub.f32 %v242_v44, %v248_v56  ;;  %v245_v58 = vpop.xlane.xlu1 %244 }
 0x368   :  { %v249_v59 = vsub.f32 %v241_v45, %v245_v58  ;;  %v657_v45 = vld [vmem:[%s1598_s5] sm:$0xff] }
 0x369   :  { %v253_v60 = vmul.f32 1.442695, %v250_v57  ;;  %1184 = vmatprep.mubr.msk.f32.mxu1 %vm37_vm0, %v657_v45 }
 0x36a   :  { %v251_v61 = vmul.f32 1.442695, %v249_v59 }
 0x36b   :  { %1344 = vpow2.f32 %v253_v60 }
 0x36c   :  { %1346 = vpow2.f32 %v251_v61 }
 0x36f   :  { %v449_v62 = vpop.xlane.xlu1 %448 }
 0x370   :  { %v453_v63 = vsub.f32 %v445_v52, %v449_v62  ;;  %v839_v52 = vld [vmem:[%s1600_s7 + $0x10] sm:$0xff] }
 0x372   :  { %v455_v2 = vmul.f32 1.442695, %v453_v63 }
 0x373   :  { %v452_v3 = vpop.xlane.xlu1 %451 }
 0x374   :  { %1348 = vpow2.f32 %v455_v2  ;;  %v454_v4 = vsub.f32 %v446_v54, %v452_v3  ;;  %v840_v54 = vld [vmem:[%s1600_s7 + $0x18] sm:$0xff]  ;;  %v658_v2 = vld [vmem:[%s1598_s5 + $0x8] sm:$0xff]  ;;  %v655_v3 = vld [vmem:[%s1597_s4] sm:$0xff] }
 0x375   :  { %v1345_v5 = vpop.eup %1344  ;;  %v1280_v55 = vpack.c.bf16 %v840_v54, %v839_v52 }
 0x376   :  { %v457_v6 = vmul.f32 1.442695, %v454_v4  ;;  %v258_v7 = vsel %vm155_vm1, %v1345_v5, 0.0  ;;  %v1347_v8 = vpop.eup %1346  ;;  %v656_v4 = vld [vmem:[%s1597_s4 + $0x8] sm:$0xff] }
 0x377   :  { %259 = vadd.xlane.f32.xlu1 %v258_v7  ;;  %v255_v9 = vsel %vm155_vm1, %v1347_v8, 0.0  ;;  %v934_v7 = vld [vmem:[%s1601_s8] sm:$0xff] }
 0x378   :  { %1350 = vpow2.f32 %v457_v6 }
 0x37b   :  { %256 = vadd.xlane.f32.xlu1 %v255_v9  ;;  %v936_v9 = vld [vmem:[%s1601_s8 + $0x10] sm:$0xff] }
 0x37e   :  { %v1349_v10 = vpop.eup %1348 }
 0x37f   :  { %v459_v11 = vsel %vm155_vm1, %v1349_v10, 0.0 }
 0x380   :  { %460 = vadd.xlane.f32.xlu0 %v459_v11  ;;  %v937_v11 = vld [vmem:[%s1601_s8 + $0x18] sm:$0xff] }
 0x382   :  { %v1351_v12 = vpop.eup %1350 }
 0x383   :  { %v462_v13 = vsel %vm155_vm1, %v1351_v12, 0.0 }
 0x384   :  { %463 = vadd.xlane.f32.xlu1 %v462_v13  ;;  %v938_v13 = vld [vmem:[%s1601_s8 + $0x20] sm:$0xff] }
 0x395   :  { %1326 = vrot.lane.b32.xlu1 %v1478_v27, %s1387_s3 }
 0x396   :  { %1321 = vrot.lane.b32.xlu0 %v1478_v27, %s1388_s27  ;;  %v557_v27 = vld [vmem:[%s1599_s6 + $0x8] sm:$0xff] }
 0x397   :  { %v1256_v33 = vpack.c.bf16 %v557_v27, %v556_v26 }
 0x404   :  { %v260_v14 = vpop.xlane.xlu1 %259 }
 0x408   :  { %v257_v15 = vpop.xlane.xlu1 %256 }
 0x409   :  { %1352 = vrcp.f32 %v257_v15 }
 0x40a   :  { %1354 = vrcp.f32 %v260_v14  ;;  %v939_v14 = vld [vmem:[%s1601_s8 + $0x28] sm:$0xff] }
 0x40b   :  { %v1292_v15 = vpack.c.bf16 %v939_v14, %v938_v13 }
 0x40d   :  { %v461_v16 = vpop.xlane.xlu0 %460 }
 0x40e   :  { %1356 = vrcp.f32 %v461_v16  ;;  %v940_v16 = vld [vmem:[%s1601_s8 + $0x30] sm:$0xff] }
 0x411   :  { %v1322_v17 = vpop.permute.xlu0 %1321  ;;  %v464_v18 = vpop.xlane.xlu1 %463 }
 0x412   :  { %v1324_v19 = vunpack.i.h.bf16 %v1322_v17  ;;  %v1323_v20 = vunpack.i.l.bf16 %v1322_v17  ;;  %1358 = vrcp.f32 %v464_v18  ;;  %v941_v17 = vld [vmem:[%s1601_s8 + $0x38] sm:$0xff] }
 0x413   :  { %v1353_v21 = vpop.eup %1352  ;;  %v1296_v18 = vpack.c.bf16 %v941_v17, %v940_v16 }
 0x414   :  { %v1242_v22 = vpack.c.bf16 %v1324_v19, %v1323_v20  ;;  %v263_v23 = vmul.f32 %v1353_v21, %v1347_v8  ;;  %v1355_v24 = vpop.eup %1354  ;;  %v935_v8 = vld [vmem:[%s1601_s8 + $0x8] sm:$0xff]  ;;  %s1033_s8 = sshll.u32 %s1389_s14, 4  ;;  %s1034_s8 = int_to_ptr.vmem [resolvable:$true] %s1033_s8 }
 0x415   :  { %v1327_v25 = vpop.permute.xlu1 %1326  ;;  %v264_v32 = vmul.f32 %v1355_v24, %v1345_v5  ;;  %p1365_p1 = scmp.lt.s32.totalorder %s1034_s8, %s1034_s8 }
 0x416   :  { %v1329_v28 = vunpack.i.h.bf16 %v1327_v25  ;;  %v1328_v29 = vunpack.i.l.bf16 %v1327_v25  ;;  %1243 = vmatprep.subr.bf16.mxu0 %v1242_v22  ;;  %1149 = vmatprep.mubr.msk.f32.mxu0 %vm155_vm1, %v263_v23 }
 0x417   :  { %1245 = vmatpush3.bf16.msra.mxu0 %v1242_v22 }
 0x418   :  { %v1357_v30 = vpop.eup %1356  ;;  %v1252_v31 = vpack.c.bf16 %v1329_v28, %v1328_v29 }
 0x419   :  { %v467_v34 = vmul.f32 %v1357_v30, %v1349_v10  ;;  %v1284_v10 = vpack.c.bf16 %v935_v8, %v934_v7 }
 0x41a   :  { %1150 = vmatmul.mubr.msk.f32.vlgmr.msra.gmra.mrb[0].mxu0 %vm155_vm1, %v264_v32  ;;  %1253 = vmatprep.subr.bf16.mxu0 %v1252_v31 }
 0x41b   :  { %1255 = vmatpush3.bf16.msra.mxu0 %v1252_v31  ;;  %1163 = vmatprep.mubr.msk.f32.mxu0 %vm155_vm1, %v467_v34 }
 0x41c   :  { %v1359_v35 = vpop.eup %1358  ;;  %1257 = vmatprep.subr.bf16.mxu0 %v1256_v33 }
 0x41d   :  { %v468_v36 = vmul.f32 %v1359_v35, %v1351_v12  ;;  %v1288_v12 = vpack.c.bf16 %v937_v11, %v936_v9 }
 0x41f   :  { %1164 = vmatmul.mubr.msk.f32.vlgmr.msra.gmra.mrb[2].mxu0 %vm155_vm1, %v468_v36 }
 0x420   :  { %1259 = vmatpush3.bf16.msra.mxu0 %v1256_v33 }
 0x421   :  { %1277 = vmatprep.subr.bf16.mxu0 %v1276_v53 }
 0x4ed   :  { %v1151_v37 = vpop.f32.mrb[0].mxu0 }
 0x4ee   :  { %v343_v38 = vpop.f32.mrb[1].mxu0 }
 0x4ef   :  { %1170 = vmatprep.mubr.msk.f32.mxu0 %vm155_vm1, %v343_v38 }
 0x4f0   :  { %1171 = vmatmul.mubr.msk.f32.vlgmr.msra.gmra.mrb[4].mxu0 %vm155_vm1, %v1151_v37 }
 0x4f1   :  { %1279 = vmatpush3.bf16.msra.mxu0 %v1276_v53 }
 0x4f2   :  { %v1165_v39 = vpop.f32.mrb[2].mxu0  ;;  %1281 = vmatprep.subr.bf16.mxu0 %v1280_v55 }
 0x4f3   :  { %v547_v40 = vpop.f32.mrb[3].mxu0 }
 0x4f4   :  { %1173 = vmatprep.mubr.msk.f32.mxu0 %vm155_vm1, %v547_v40 }
 0x4f5   :  { %1174 = vmatmul.mubr.msk.f32.gmra.mrb[6].mxu0 %vm155_vm1, %v1165_v39 }
 0x4f6   :  { %1283 = vmatpush3.bf16.msra.mxu0 %v1280_v55 }
 0x4f7   :  { %1285 = vmatprep.subr.bf16.mxu0 %v1284_v10 }
 0x5c3   :  { %v1172_v41 = vpop.f32.mrb[4].mxu0 }
 0x5c4   :  { %v636_v42 = vpop.f32.mrb[5].mxu0 }
 0x5c5   :  { %v1330_v43 = vpack.i.bf16 %v1172_v41, %v636_v42  ;;  %v1268_v44 = vpack.c.bf16 %v1172_v41, %v636_v42 }
 0x5c7   :  { %1331 = vrot.lane.b32.xlu1 %v1330_v43, %s1385_s1 }
 0x5c8   :  { %v1175_v46 = vpop.f32.mrb[6].mxu0 }
 0x5c9   :  { %v646_v47 = vpop.f32.mrb[7].mxu0 }
 0x5ca   :  { %v1335_v48 = vpack.i.bf16 %v1175_v46, %v646_v47  ;;  %v1272_v49 = vpack.c.bf16 %v1175_v46, %v646_v47 }
 0x5cc   :  { %1336 = vrot.lane.b32.xlu0 %v1335_v48, %s1385_s1 }
 0x639   :  { %v1332_v56 = vpop.permute.xlu1 %1331 }
 0x63a   :  { %v1334_v57 = vunpack.i.h.bf16 %v1332_v56  ;;  %v1333_v58 = vunpack.i.l.bf16 %v1332_v56 }
 0x63c   :  { %v1260_v59 = vpack.c.bf16 %v1334_v57, %v1333_v58 }
 0x63e   :  { %1261 = vmatprep.subr.bf16.mxu1 %v1260_v59  ;;  %v1337_v60 = vpop.permute.xlu0 %1336 }
 0x63f   :  { %v1339_v61 = vunpack.i.h.bf16 %v1337_v60  ;;  %v1338_v62 = vunpack.i.l.bf16 %v1337_v60  ;;  %1263 = vmatpush3.bf16.msra.mxu1 %v1260_v59 }
 0x641   :  { %v1264_v63 = vpack.c.bf16 %v1339_v61, %v1338_v62 }
 0x643   :  { %1265 = vmatprep.subr.bf16.mxu1 %v1264_v63 }
 0x644   :  { %1267 = vmatpush3.bf16.msra.mxu1 %v1264_v63 }
 0x645   :  { %1269 = vmatprep.subr.bf16.mxu1 %v1268_v44 }
 0x647   :  { %1185 = vmatmul.mubr.msk.f32.vlgmr.msra.gmra.mrb[6].mxu1 %vm37_vm0, %v658_v2 }
 0x648   :  { %1271 = vmatpush3.bf16.msra.mxu1 %v1268_v44  ;;  %1195 = vmatprep.mubr.msk.f32.mxu1 %vm37_vm0, %v655_v3 }
 0x649   :  { %1273 = vmatprep.subr.bf16.mxu1 %v1272_v49 }
 0x64c   :  { %1275 = vmatpush3.bf16.msra.mxu1 %v1272_v49 }
 0x64f   :  { %1196 = vmatmul.mubr.msk.f32.vlgmr.msra.gmra.mrb[6].mxu1 %vm37_vm0, %v656_v4 }
 0x722   :  { %v1197_v5 = vpop.f32.mrb[6].mxu1 }
 0x723   :  { %v828_v6 = vpop.f32.mrb[7].mxu1 }
 0x724   :  { %1206 = vmatprep.mubr.msk.f32.mxu0 %vm37_vm0, %v828_v6 }
 0x725   :  { %1207 = vmatmul.mubr.msk.f32.vlgmr.msra.gmra.mrb[8].mxu0 %vm37_vm0, %v1197_v5 }
 0x726   :  { %1287 = vmatpush3.bf16.msra.mxu0 %v1284_v10 }
 0x727   :  { %1289 = vmatprep.subr.bf16.mxu0 %v1288_v12 }
 0x72a   :  { %1291 = vmatpush3.bf16.msra.mxu0 %v1288_v12 }
 0x72b   :  { %1293 = vmatprep.subr.bf16.mxu0 %v1292_v15 }
 0x72e   :  { %1295 = vmatpush3.bf16.msra.mxu0 %v1292_v15 }
 0x72f   :  { %1297 = vmatprep.subr.bf16.mxu0 %v1296_v18 }
 0x732   :  { %1299 = vmatpush3.bf16.msra.mxu0 %v1296_v18 }
 0x7f8   :  { %v1208_v19 = vpop.f32.mrb[8].mxu0 }
 0x7f9   :  { %928 = vrot.lane.b32.xlu0 %v1208_v19, %s1388_s27  ;;  %v913_v20 = vpop.f32.mrb[9].mxu0  ;;  %v923_v23 = vmax.f32 %v1208_v19, 0.0 }
 0x7fa   :  { %926 = vrot.lane.b32.xlu1 %v913_v20, %s1388_s27  ;;  %v922_v21 = vmax.f32 %v913_v20, 0.0  ;;  %s1360_s27 = scalar_lea.vmem %s1034_s8, 256 }
 0x7fb   :  { %p1361_p0 = scmp.ne.s32.totalorder %s1034_s8, %s1360_s27  ;;  %p1366_p2 = scmp.lt.s32.totalorder %s1360_s27, %s1360_s27 }
 0x7fd   :  { %p1367_p3 = por %p1366_p2, %p1365_p1 }
 0x7ff   :  { %p1368_p4 = pnand %p1367_p3, %p1361_p0 }
 0x86b   :  { %v929_v22 = vpop.permute.xlu0 %928 }
 0x86c   :  { %v927_v24 = vpop.permute.xlu1 %926  ;;  %v933_v26 = vadd.f32 %v929_v22, %v923_v23 }
 0x86d   :  { %v932_v25 = vadd.f32 %v927_v24, %v922_v21 }
 0x86f   :  { %1225 = vmatprep.mubr.msk.f32.mxu0 %vm942_vm3, %v932_v25 }
 0x870   :  { %1226 = vmatmul.mubr.msk.f32.vlgmr.msra.gmra.mrb[10].mxu0 %vm942_vm3, %v933_v26 }
 0x943   :  { %v1227_v27 = vpop.f32.mrb[10].mxu0 }
 0x944   :  { %v1025_v28 = vadd.f32 %v1227_v27, %v1450_v1  ;;  %v1015_v29 = vpop.f32.mrb[11].mxu0 }
 0x945   :  { %v1024_v30 = vadd.f32 %v1015_v29, %v1445_v0 }
 0x946   :  { %1027 = vst.msk [vmem:[#allocation2 + $0x8] sm:$0xff] %vm37_vm0, %v1025_v28 }
 0x947   :  { %1026 = vst.msk [vmem:[#allocation2] sm:$0xff] %vm37_vm0, %v1024_v30 }
 0x948   :  { %1371 = shalt.err (!%p1368_p4)
}
 0x949   :  { %s1372_s16 = scalar_lea.hbm %s1602_s9, 256 }
 0x94a   :  { %p1373_p5 = scmp.ne.s32.totalorder %s1602_s9, %s1372_s16  ;;  %p1376_p6 = scmp.lt.u32.totalorder %s1372_s16, %s1602_s9 }
 0x94c   :  { %p1378_p7 = pnand %p1376_p6, %p1373_p5 }
 0x94e   :  { %1381 = shalt.err (!%p1378_p7)
}
 0x94f   :  { %s1390_s7 = smov 128   ;;  %s1391_s21 = smov 8  }
 0x950   :  { %1039 = dma.vmem_to_hbm [thread:$0]  %s1034_s8, 256, %s1602_s9, [#allocation3], %s1390_s7, %s1390_s7, %s1391_s21  }
 0x951   :  { %1382 = dma.done.wait [#allocation3], 256  }
 0x952   :  { %1383 = vsyncadd [#allocation3], 4294967040 }
 0x953   :  { %1043 = vsyncpa [#allocation3], 1 }

</bundles_post_ra>
